<compile_context>
chip_gen: v6e
topology: v6e:2x2x1
jax: 0.10.0
libtpu: 0.0.40
codegen_flags: <defaults>
</compile_context>

<pallas_src>
from functools import partial

import jax
import jax.numpy as jnp
from jax.experimental import pallas as pl
from jax.experimental.pallas import tpu as pltpu


def attention_pool_kernel(x_ref, pos0_ref, poss_ref,
                          wq_ref, bq_ref, wkv_ref, bkv_ref, wc_ref, bc_ref,
                          sel_ref, selt_ref, o_ref, xt_ref, mean_ref,
                          *, num_heads, head_dim):
    bt, C, hw = x_ref.shape
    scale = 1.0 / (head_dim ** 0.5)

    pos_s = poss_ref[...]                                        # (hw, C)

    # Channels-last spatial tokens: per-batch (C,hw)->(hw,C) transpose on the XLU, written
    # into a VMEM scratch slab; also collect the per-batch spatial mean (the query token).
    for b in range(bt):                                          # static unroll (bt is small)
        xb = x_ref[b].T                                          # (hw, C) raw spatial tokens
        xt_ref[pl.ds(b * hw, hw), :] = xb + pos_s                # tokens 1..hw (+pos)
        mean_ref[pl.ds(b, 1), :] = jnp.mean(xb, axis=0, keepdims=True)

    t0 = mean_ref[...] + pos0_ref[...]                           # (bt, C)  token 0 (= query)
    t0b = t0.astype(jnp.bfloat16)
    tsb = xt_ref[...].astype(jnp.bfloat16)                       # (bt*hw, C)

    # Projections: bf16 MXU inputs, f32 accumulation.
    q = (jnp.dot(t0b, wq_ref[...], preferred_element_type=jnp.float32)
         + bq_ref[...]) * scale                                  # (bt, C)
    kv0 = jnp.dot(t0b, wkv_ref[...], preferred_element_type=jnp.float32) + bkv_ref[...]
    kvs = jnp.dot(tsb, wkv_ref[...], preferred_element_type=jnp.float32) + bkv_ref[...]
    k0, v0 = kv0[:, :C], kv0[:, C:]                              # (bt, C) each
    ks, vs = kvs[:, :C], kvs[:, C:]                              # (bt*hw, C) each

    sel = sel_ref[...]                                           # (C, nh)  0/1 head selector
    sel_t = selt_ref[...]                                        # (nh, C)

    # Per-head scores via block-diagonal selector matmul (no reshape of the channel axis).
    s0 = jnp.dot(q * k0, sel, preferred_element_type=jnp.float32)           # (bt, nh)
    qk = ks.reshape(bt, hw, C) * q[:, None, :]                              # (bt, hw, C)
    ss = jnp.dot(qk.reshape(bt * hw, C), sel,
                 preferred_element_type=jnp.float32).reshape(bt, hw, num_heads)

    # Softmax over the L = hw+1 key/value tokens, per (batch, head); f32 throughout.
    m = jnp.maximum(jnp.max(ss, axis=1), s0)                                # (bt, nh)
    e0 = jnp.exp(s0 - m)                                                    # (bt, nh)
    es = jnp.exp(ss - m[:, None, :])                                        # (bt, hw, nh)
    inv = pl.reciprocal(e0 + jnp.sum(es, axis=1), approx=True)              # (bt, nh)

    # Broadcast head weights back to channels and accumulate the context vector.
    a0 = jnp.dot(e0 * inv, sel_t, preferred_element_type=jnp.float32)       # (bt, C)
    af = jnp.dot((es * inv[:, None, :]).reshape(bt * hw, num_heads), sel_t,
                 preferred_element_type=jnp.float32)                        # (bt*hw, C)
    ctx = a0 * v0 + jnp.sum((af * vs).reshape(bt, hw, C), axis=1)           # (bt, C)

    # Output projection.
    y = jnp.dot(ctx.astype(jnp.bfloat16), wc_ref[...],
                preferred_element_type=jnp.float32) + bc_ref[...]           # (bt, O)
    o_ref[...] = y.astype(o_ref.dtype)


def attention_pool(x, pos_emb, wq, bq, wk, bk, wv, bv, wc, bc, num_heads, b_tile=None):
    """x: (N, C, H, W) f32.  pos_emb: (H*W+1, C).  w*: PyTorch Linear weights (out, in), b*: (out,).
    Returns (N, output_dim), matching AttentionPool.forward."""
    N, C, H, W = x.shape
    HW = H * W
    O = wc.shape[0]
    assert C % num_heads == 0
    head_dim = C // num_heads
    # TODO(synk): for HW not a multiple of 8, pad spatial tokens and mask them in the softmax;
    # the in-kernel (bt*HW) <-> (bt, HW) reshapes assume sublane-aligned HW.
    assert HW % 8 == 0, "HW must be a multiple of 8 for this kernel"

    if b_tile is None:
        target = max(1, 256 // HW)           # target ~256 MXU rows per step (v6e/v7x MXU)
        b_tile = N if N <= target else max(8, (target // 8) * 8)
    grid_n = pl.cdiv(N, b_tile)
    n_pad = grid_n * b_tile

    x_tok = x.reshape(N, C, HW)              # contiguous reshape only; no host transpose
    if n_pad != N:
        x_tok = jnp.pad(x_tok, ((0, n_pad - N), (0, 0), (0, 0)))

    pos0 = pos_emb[0:1].astype(jnp.float32)                      # (1, C)   query-token pos
    pos_s = pos_emb[1:].astype(jnp.float32)                      # (HW, C)  spatial-token pos

    # Fused / transposed weights: activations are channels-last, so pass W^T (bf16 for MXU).
    wq_t = wq.T.astype(jnp.bfloat16)                             # (C, C)
    wkv_t = jnp.concatenate([wk.T, wv.T], axis=1).astype(jnp.bfloat16)   # (C, 2C)
    wc_t = wc.T.astype(jnp.bfloat16)                             # (C, O)
    bq_r = bq.reshape(1, C).astype(jnp.float32)
    bkv_r = jnp.concatenate([bk, bv]).reshape(1, 2 * C).astype(jnp.float32)
    bc_r = bc.reshape(1, O).astype(jnp.float32)

    # 0/1 head-selector matrices, precomputed once (VMEM-resident in the kernel).
    head_of = jnp.arange(C, dtype=jnp.int32) // head_dim
    sel = (head_of[:, None] == jnp.arange(num_heads, dtype=jnp.int32)[None, :]
           ).astype(jnp.float32)                                 # (C, nh)
    sel_t = sel.T                                                # (nh, C)

    kernel = partial(attention_pool_kernel, num_heads=num_heads, head_dim=head_dim)
    const = lambda n: (0, 0)

    out = pl.pallas_call(
        kernel,
        out_shape=jax.ShapeDtypeStruct((n_pad, O), jnp.float32),
        grid=(grid_n,),
        in_specs=[
            pl.BlockSpec((b_tile, C, HW), lambda n: (n, 0, 0)),  # x tile, original layout
            pl.BlockSpec((1, C), const),                         # pos[0]
            pl.BlockSpec((HW, C), const),                        # pos[1:]
            pl.BlockSpec((C, C), const),                         # Wq^T            (bf16)
            pl.BlockSpec((1, C), const),                         # bq
            pl.BlockSpec((C, 2 * C), const),                     # [Wk^T | Wv^T]   (bf16)
            pl.BlockSpec((1, 2 * C), const),                     # [bk | bv]
            pl.BlockSpec((C, O), const),                         # Wc^T            (bf16)
            pl.BlockSpec((1, O), const),                         # bc
            pl.BlockSpec((C, num_heads), const),                 # sel
            pl.BlockSpec((num_heads, C), const),                 # sel_t
        ],
        out_specs=pl.BlockSpec((b_tile, O), lambda n: (n, 0)),   # lane-dense output slab
        scratch_shapes=[
            pltpu.VMEM((b_tile * HW, C), jnp.float32),           # channels-last token slab
            pltpu.VMEM((b_tile, C), jnp.float32),                # per-batch mean tokens
        ],
        compiler_params=pltpu.CompilerParams(
            dimension_semantics=("parallel",),
            vmem_limit_bytes=32 * 1024 * 1024,
        ),
    )(x_tok, pos0, pos_s, wq_t, bq_r, wkv_t, bkv_r, wc_t, bc_r, sel, sel_t)

    return out[:N]


def _reference(x, pos_emb, wq, bq, wk, bk, wv, bv, wc, bc, num_heads):
    # Pure-JAX reference mirroring F.multi_head_attention_forward semantics.
    N, C, H, W = x.shape
    HW = H * W
    d = C // num_heads
    xt = jnp.transpose(x.reshape(N, C, HW), (2, 0, 1))                      # (HW, N, C)
    t = jnp.concatenate([jnp.mean(xt, axis=0, keepdims=True), xt], axis=0)  # (L, N, C)
    t = t + pos_emb[:, None, :]
    L = HW + 1
    q = t[0:1] @ wq.T + bq                                                  # (1, N, C)
    k = t @ wk.T + bk                                                       # (L, N, C)
    v = t @ wv.T + bv                                                       # (L, N, C)
    qh = q.reshape(1, N, num_heads, d)
    kh = k.reshape(L, N, num_heads, d)
    vh = v.reshape(L, N, num_heads, d)
    scores = jnp.einsum('qnhd,knhd->nhqk', qh, kh) / (d ** 0.5)
    attn = jax.nn.softmax(scores, axis=-1)
    ctx = jnp.einsum('nhqk,knhd->qnhd', attn, vh).reshape(1, N, C)
    out = ctx @ wc.T + bc                                                   # (1, N, O)
    return out[0]


if __name__ == "__main__":
    key = jax.random.PRNGKey(0)
    keys = jax.random.split(key, 10)

    B, C, H, W = 2, 32, 4, 4       # batch=2, embed_dim=32, 4x4 feature map
    num_heads = 4
    out_dim = 16
    L = H * W + 1

    x = jax.random.normal(keys[0], (B, C, H, W), dtype=jnp.float32)
    pos_emb = jax.random.normal(keys[1], (L, C), dtype=jnp.float32) / (C ** 0.5)
    wq = jax.random.normal(keys[2], (C, C), dtype=jnp.float32) * 0.1
    bq = jax.random.normal(keys[3], (C,), dtype=jnp.float32) * 0.1
    wk = jax.random.normal(keys[4], (C, C), dtype=jnp.float32) * 0.1
    bk = jax.random.normal(keys[5], (C,), dtype=jnp.float32) * 0.1
    wv = jax.random.normal(keys[6], (C, C), dtype=jnp.float32) * 0.1
    bv = jax.random.normal(keys[7], (C,), dtype=jnp.float32) * 0.1
    wc = jax.random.normal(keys[8], (out_dim, C), dtype=jnp.float32) * 0.1
    bc = jax.random.normal(keys[9], (out_dim,), dtype=jnp.float32) * 0.1

    out = attention_pool(x, pos_emb, wq, bq, wk, bk, wv, bv, wc, bc, num_heads)
    out = jax.block_until_ready(out)

    ref = jax.block_until_ready(
        _reference(x, pos_emb, wq, bq, wk, bk, wv, bv, wc, bc, num_heads))
    assert out.shape == (B, out_dim), out.shape
    # bf16 MXU inputs (f32 accumulation) -> slightly looser tolerance than pure-f32.
    assert jnp.allclose(out, ref, atol=2e-2, rtol=2e-2), float(jnp.max(jnp.abs(out - ref)))

    print("KERNEL_OK")
</pallas_src>

<mosaic_0001>
module attributes {stable_mosaic.version = 11 : i64} {
  func.func @attention_pool_kernel(%arg0: i32, %arg1: memref<2x32x16xf32, #tpu.memory_space<vmem>>, %arg2: memref<1x32xf32, #tpu.memory_space<vmem>>, %arg3: memref<16x32xf32, #tpu.memory_space<vmem>>, %arg4: memref<32x32xbf16, #tpu.memory_space<vmem>>, %arg5: memref<1x32xf32, #tpu.memory_space<vmem>>, %arg6: memref<32x64xbf16, #tpu.memory_space<vmem>>, %arg7: memref<1x64xf32, #tpu.memory_space<vmem>>, %arg8: memref<32x16xbf16, #tpu.memory_space<vmem>>, %arg9: memref<1x16xf32, #tpu.memory_space<vmem>>, %arg10: memref<32x4xf32, #tpu.memory_space<vmem>>, %arg11: memref<4x32xf32, #tpu.memory_space<vmem>>, %arg12: memref<2x16xf32, #tpu.memory_space<vmem>>, %arg13: memref<32x32xf32, #tpu.memory_space<vmem>>, %arg14: memref<2x32xf32, #tpu.memory_space<vmem>>) attributes {dimension_semantics = [#tpu.dimension_semantics<parallel>], iteration_bounds = array<i64: 1>, scalar_prefetch = 0 : i64, scratch_operands = 2 : i64, tpu.core_type = #tpu.core_type<tc>, window_params = [{transform_indices = @transform_0, window_bounds = array<i64: 2, 32, 16>}, {pipeline_mode = #tpu.pipeline_mode<synchronous>, transform_indices = @transform_1, window_bounds = array<i64: 1, 32>}, {pipeline_mode = #tpu.pipeline_mode<synchronous>, transform_indices = @transform_2, window_bounds = array<i64: 16, 32>}, {pipeline_mode = #tpu.pipeline_mode<synchronous>, transform_indices = @transform_3, window_bounds = array<i64: 32, 32>}, {pipeline_mode = #tpu.pipeline_mode<synchronous>, transform_indices = @transform_4, window_bounds = array<i64: 1, 32>}, {pipeline_mode = #tpu.pipeline_mode<synchronous>, transform_indices = @transform_5, window_bounds = array<i64: 32, 64>}, {pipeline_mode = #tpu.pipeline_mode<synchronous>, transform_indices = @transform_6, window_bounds = array<i64: 1, 64>}, {pipeline_mode = #tpu.pipeline_mode<synchronous>, transform_indices = @transform_7, window_bounds = array<i64: 32, 16>}, {pipeline_mode = #tpu.pipeline_mode<synchronous>, transform_indices = @transform_8, window_bounds = array<i64: 1, 16>}, {pipeline_mode = #tpu.pipeline_mode<synchronous>, transform_indices = @transform_9, window_bounds = array<i64: 32, 4>}, {pipeline_mode = #tpu.pipeline_mode<synchronous>, transform_indices = @transform_10, window_bounds = array<i64: 4, 32>}, {transform_indices = @transform_11, window_bounds = array<i64: 2, 16>}]} {
    %c0 = arith.constant 0 : index
    %c0_0 = arith.constant 0 : index
    %0 = vector.load %arg3[%c0, %c0_0] : memref<16x32xf32, #tpu.memory_space<vmem>>, vector<16x32xf32>
    %c0_1 = arith.constant 0 : index
    %c0_2 = arith.constant 0 : index
    %c0_3 = arith.constant 0 : index
    %1 = vector.load %arg1[%c0_1, %c0_2, %c0_3] : memref<2x32x16xf32, #tpu.memory_space<vmem>>, vector<1x32x16xf32>
    %2 = vector.shape_cast %1 : vector<1x32x16xf32> to vector<32x16xf32>
    %3 = tpu.transpose %2, [1, 0] : vector<32x16xf32> -> vector<16x32xf32>
    %4 = arith.addf %3, %0 : vector<16x32xf32>
    %c0_4 = arith.constant 0 : index
    %c0_5 = arith.constant 0 : index
    %5 = vector.load %arg13[%c0_4, %c0_5] : memref<32x32xf32, #tpu.memory_space<vmem>>, vector<16x32xf32>
    tpu.vector_store %arg13[%c0_4, %c0_5], %4 {strides = array<i32>} : memref<32x32xf32, #tpu.memory_space<vmem>>, vector<16x32xf32>,
    %cst = arith.constant dense<0.000000e+00> : vector<32xf32>
    %6 = vector.multi_reduction <add>, %3, %cst [0] : vector<16x32xf32> to vector<32xf32>
    %7 = vector.shape_cast %6 : vector<32xf32> to vector<1x32xf32>
    %cst_6 = arith.constant 1.600000e+01 : f32
    %8 = vector.broadcast %cst_6 : f32 to vector<1x32xf32>
    %9 = arith.divf %7, %8 : vector<1x32xf32>
    %c0_7 = arith.constant 0 : index
    %c0_8 = arith.constant 0 : index
    %10 = vector.load %arg14[%c0_7, %c0_8] : memref<2x32xf32, #tpu.memory_space<vmem>>, vector<1x32xf32>
    tpu.vector_store %arg14[%c0_7, %c0_8], %9 {strides = array<i32>} : memref<2x32xf32, #tpu.memory_space<vmem>>, vector<1x32xf32>,
    %c1 = arith.constant 1 : index
    %c0_9 = arith.constant 0 : index
    %c0_10 = arith.constant 0 : index
    %11 = vector.load %arg1[%c1, %c0_9, %c0_10] : memref<2x32x16xf32, #tpu.memory_space<vmem>>, vector<1x32x16xf32>
    %12 = vector.shape_cast %11 : vector<1x32x16xf32> to vector<32x16xf32>
    %13 = tpu.transpose %12, [1, 0] : vector<32x16xf32> -> vector<16x32xf32>
    %14 = arith.addf %13, %0 : vector<16x32xf32>
    %c16 = arith.constant 16 : index
    %c0_11 = arith.constant 0 : index
    %15 = vector.load %arg13[%c16, %c0_11] : memref<32x32xf32, #tpu.memory_space<vmem>>, vector<16x32xf32>
    tpu.vector_store %arg13[%c16, %c0_11], %14 {strides = array<i32>} : memref<32x32xf32, #tpu.memory_space<vmem>>, vector<16x32xf32>,
    %cst_12 = arith.constant dense<0.000000e+00> : vector<32xf32>
    %16 = vector.multi_reduction <add>, %13, %cst_12 [0] : vector<16x32xf32> to vector<32xf32>
    %17 = vector.shape_cast %16 : vector<32xf32> to vector<1x32xf32>
    %cst_13 = arith.constant 1.600000e+01 : f32
    %18 = vector.broadcast %cst_13 : f32 to vector<1x32xf32>
    %19 = arith.divf %17, %18 : vector<1x32xf32>
    %c1_14 = arith.constant 1 : index
    %c0_15 = arith.constant 0 : index
    %20 = vector.load %arg14[%c1_14, %c0_15] : memref<2x32xf32, #tpu.memory_space<vmem>>, vector<1x32xf32>
    tpu.vector_store %arg14[%c1_14, %c0_15], %19 {strides = array<i32>} : memref<2x32xf32, #tpu.memory_space<vmem>>, vector<1x32xf32>,
    %c0_16 = arith.constant 0 : index
    %c0_17 = arith.constant 0 : index
    %21 = vector.load %arg14[%c0_16, %c0_17] : memref<2x32xf32, #tpu.memory_space<vmem>>, vector<2x32xf32>
    %c0_18 = arith.constant 0 : index
    %c0_19 = arith.constant 0 : index
    %22 = vector.load %arg2[%c0_18, %c0_19] : memref<1x32xf32, #tpu.memory_space<vmem>>, vector<1x32xf32>
    %23 = vector.broadcast %22 : vector<1x32xf32> to vector<2x32xf32>
    %24 = arith.addf %21, %23 : vector<2x32xf32>
    %25 = arith.truncf %24 : vector<2x32xf32> to vector<2x32xbf16>
    %c0_20 = arith.constant 0 : index
    %c0_21 = arith.constant 0 : index
    %26 = vector.load %arg13[%c0_20, %c0_21] : memref<32x32xf32, #tpu.memory_space<vmem>>, vector<32x32xf32>
    %27 = arith.truncf %26 : vector<32x32xf32> to vector<32x32xbf16>
    %c0_22 = arith.constant 0 : index
    %c0_23 = arith.constant 0 : index
    %28 = vector.load %arg4[%c0_22, %c0_23] : memref<32x32xbf16, #tpu.memory_space<vmem>>, vector<32x32xbf16>
    %cst_24 = arith.constant dense<0.000000e+00> : vector<2x32xf32>
    %29 = tpu.matmul %25, %28, %cst_24 {dimension_numbers = #tpu.dot_dimension_numbers<[1], [0], [0], [1], [0, 0, 1, 1], [], []>} : vector<2x32xbf16>, vector<32x32xbf16>, vector<2x32xf32> -> vector<2x32xf32>
    %c0_25 = arith.constant 0 : index
    %c0_26 = arith.constant 0 : index
    %30 = vector.load %arg5[%c0_25, %c0_26] : memref<1x32xf32, #tpu.memory_space<vmem>>, vector<1x32xf32>
    %31 = vector.broadcast %30 : vector<1x32xf32> to vector<2x32xf32>
    %32 = arith.addf %29, %31 : vector<2x32xf32>
    %cst_27 = arith.constant 0.353553385 : f32
    %33 = vector.broadcast %cst_27 : f32 to vector<2x32xf32>
    %34 = arith.mulf %32, %33 : vector<2x32xf32>
    %c0_28 = arith.constant 0 : index
    %c0_29 = arith.constant 0 : index
    %35 = vector.load %arg6[%c0_28, %c0_29] : memref<32x64xbf16, #tpu.memory_space<vmem>>, vector<32x64xbf16>
    %cst_30 = arith.constant dense<0.000000e+00> : vector<2x64xf32>
    %36 = tpu.matmul %25, %35, %cst_30 {dimension_numbers = #tpu.dot_dimension_numbers<[1], [0], [0], [1], [0, 0, 1, 1], [], []>} : vector<2x32xbf16>, vector<32x64xbf16>, vector<2x64xf32> -> vector<2x64xf32>
    %c0_31 = arith.constant 0 : index
    %c0_32 = arith.constant 0 : index
    %37 = vector.load %arg7[%c0_31, %c0_32] : memref<1x64xf32, #tpu.memory_space<vmem>>, vector<1x64xf32>
    %38 = vector.broadcast %37 : vector<1x64xf32> to vector<2x64xf32>
    %39 = arith.addf %36, %38 : vector<2x64xf32>
    %c0_33 = arith.constant 0 : index
    %c0_34 = arith.constant 0 : index
    %40 = vector.load %arg6[%c0_33, %c0_34] : memref<32x64xbf16, #tpu.memory_space<vmem>>, vector<32x64xbf16>
    %cst_35 = arith.constant dense<0.000000e+00> : vector<32x64xf32>
    %41 = tpu.matmul %27, %40, %cst_35 {dimension_numbers = #tpu.dot_dimension_numbers<[1], [0], [0], [1], [0, 0, 1, 1], [], []>} : vector<32x32xbf16>, vector<32x64xbf16>, vector<32x64xf32> -> vector<32x64xf32>
    %c0_36 = arith.constant 0 : index
    %c0_37 = arith.constant 0 : index
    %42 = vector.load %arg7[%c0_36, %c0_37] : memref<1x64xf32, #tpu.memory_space<vmem>>, vector<1x64xf32>
    %43 = vector.broadcast %42 : vector<1x64xf32> to vector<32x64xf32>
    %44 = arith.addf %41, %43 : vector<32x64xf32>
    %45 = vector.extract_strided_slice %39 {offsets = [0, 0], sizes = [2, 32], strides = [1, 1]} : vector<2x64xf32> to vector<2x32xf32>
    %46 = vector.extract_strided_slice %39 {offsets = [0, 32], sizes = [2, 32], strides = [1, 1]} : vector<2x64xf32> to vector<2x32xf32>
    %47 = vector.extract_strided_slice %44 {offsets = [0, 0], sizes = [32, 32], strides = [1, 1]} : vector<32x64xf32> to vector<32x32xf32>
    %48 = vector.extract_strided_slice %44 {offsets = [0, 32], sizes = [32, 32], strides = [1, 1]} : vector<32x64xf32> to vector<32x32xf32>
    %c0_38 = arith.constant 0 : index
    %c0_39 = arith.constant 0 : index
    %49 = vector.load %arg10[%c0_38, %c0_39] : memref<32x4xf32, #tpu.memory_space<vmem>>, vector<32x4xf32>
    %c0_40 = arith.constant 0 : index
    %c0_41 = arith.constant 0 : index
    %50 = vector.load %arg11[%c0_40, %c0_41] : memref<4x32xf32, #tpu.memory_space<vmem>>, vector<4x32xf32>
    %51 = arith.mulf %34, %45 : vector<2x32xf32>
    %cst_42 = arith.constant dense<0.000000e+00> : vector<2x4xf32>
    %52 = tpu.matmul %51, %49, %cst_42 {dimension_numbers = #tpu.dot_dimension_numbers<[1], [0], [0], [1], [0, 0, 1, 1], [], []>} : vector<2x32xf32>, vector<32x4xf32>, vector<2x4xf32> -> vector<2x4xf32>
    %53 = vector.shape_cast %47 : vector<32x32xf32> to vector<2x16x32xf32>
    %54 = vector.shape_cast %34 : vector<2x32xf32> to vector<2x1x32xf32>
    %55 = vector.broadcast %54 : vector<2x1x32xf32> to vector<2x16x32xf32>
    %56 = arith.mulf %53, %55 : vector<2x16x32xf32>
    %57 = vector.shape_cast %56 : vector<2x16x32xf32> to vector<32x32xf32>
    %cst_43 = arith.constant dense<0.000000e+00> : vector<32x4xf32>
    %58 = tpu.matmul %57, %49, %cst_43 {dimension_numbers = #tpu.dot_dimension_numbers<[1], [0], [0], [1], [0, 0, 1, 1], [], []>} : vector<32x32xf32>, vector<32x4xf32>, vector<32x4xf32> -> vector<32x4xf32>
    %59 = vector.shape_cast %58 : vector<32x4xf32> to vector<2x16x4xf32>
    %cst_44 = arith.constant dense<0xFF800000> : vector<2x4xf32>
    %60 = vector.multi_reduction <maximumf>, %59, %cst_44 [1] : vector<2x16x4xf32> to vector<2x4xf32>
    %61 = arith.maximumf %60, %52 : vector<2x4xf32>
    %62 = arith.subf %52, %61 : vector<2x4xf32>
    %63 = math.exp %62 : vector<2x4xf32>
    %64 = vector.shape_cast %61 : vector<2x4xf32> to vector<2x1x4xf32>
    %65 = vector.broadcast %64 : vector<2x1x4xf32> to vector<2x16x4xf32>
    %66 = arith.subf %59, %65 : vector<2x16x4xf32>
    %67 = math.exp %66 : vector<2x16x4xf32>
    %cst_45 = arith.constant dense<0.000000e+00> : vector<2x4xf32>
    %68 = vector.multi_reduction <add>, %67, %cst_45 [1] : vector<2x16x4xf32> to vector<2x4xf32>
    %69 = arith.addf %63, %68 : vector<2x4xf32>
    %70 = tpu.reciprocal %69 {approx = true} : vector<2x4xf32> -> vector<2x4xf32>
    %71 = arith.mulf %63, %70 : vector<2x4xf32>
    %cst_46 = arith.constant dense<0.000000e+00> : vector<2x32xf32>
    %72 = tpu.matmul %71, %50, %cst_46 {dimension_numbers = #tpu.dot_dimension_numbers<[1], [0], [0], [1], [0, 0, 1, 1], [], []>} : vector<2x4xf32>, vector<4x32xf32>, vector<2x32xf32> -> vector<2x32xf32>
    %73 = vector.shape_cast %70 : vector<2x4xf32> to vector<2x1x4xf32>
    %74 = vector.broadcast %73 : vector<2x1x4xf32> to vector<2x16x4xf32>
    %75 = arith.mulf %67, %74 : vector<2x16x4xf32>
    %76 = vector.shape_cast %75 : vector<2x16x4xf32> to vector<32x4xf32>
    %cst_47 = arith.constant dense<0.000000e+00> : vector<32x32xf32>
    %77 = tpu.matmul %76, %50, %cst_47 {dimension_numbers = #tpu.dot_dimension_numbers<[1], [0], [0], [1], [0, 0, 1, 1], [], []>} : vector<32x4xf32>, vector<4x32xf32>, vector<32x32xf32> -> vector<32x32xf32>
    %78 = arith.mulf %72, %46 : vector<2x32xf32>
    %79 = arith.mulf %77, %48 : vector<32x32xf32>
    %80 = vector.shape_cast %79 : vector<32x32xf32> to vector<2x16x32xf32>
    %cst_48 = arith.constant dense<0.000000e+00> : vector<2x32xf32>
    %81 = vector.multi_reduction <add>, %80, %cst_48 [1] : vector<2x16x32xf32> to vector<2x32xf32>
    %82 = arith.addf %78, %81 : vector<2x32xf32>
    %83 = arith.truncf %82 : vector<2x32xf32> to vector<2x32xbf16>
    %c0_49 = arith.constant 0 : index
    %c0_50 = arith.constant 0 : index
    %84 = vector.load %arg8[%c0_49, %c0_50] : memref<32x16xbf16, #tpu.memory_space<vmem>>, vector<32x16xbf16>
    %cst_51 = arith.constant dense<0.000000e+00> : vector<2x16xf32>
    %85 = tpu.matmul %83, %84, %cst_51 {dimension_numbers = #tpu.dot_dimension_numbers<[1], [0], [0], [1], [0, 0, 1, 1], [], []>} : vector<2x32xbf16>, vector<32x16xbf16>, vector<2x16xf32> -> vector<2x16xf32>
    %c0_52 = arith.constant 0 : index
    %c0_53 = arith.constant 0 : index
    %86 = vector.load %arg9[%c0_52, %c0_53] : memref<1x16xf32, #tpu.memory_space<vmem>>, vector<1x16xf32>
    %87 = vector.broadcast %86 : vector<1x16xf32> to vector<2x16xf32>
    %88 = arith.addf %85, %87 : vector<2x16xf32>
    %c0_54 = arith.constant 0 : index
    %c0_55 = arith.constant 0 : index
    %89 = vector.load %arg12[%c0_54, %c0_55] : memref<2x16xf32, #tpu.memory_space<vmem>>, vector<2x16xf32>
    tpu.vector_store %arg12[%c0_54, %c0_55], %88 {strides = array<i32>} : memref<2x16xf32, #tpu.memory_space<vmem>>, vector<2x16xf32>,
    return
  }
  func.func @transform_0(%arg0: i32) -> (i32, i32, i32) {
    %c0_i32 = arith.constant 0 : i32
    %c0_i32_0 = arith.constant 0 : i32
    %c0_i32_1 = arith.constant 0 : i32
    return %arg0, %c0_i32, %c0_i32_0 : i32, i32, i32
  }
  func.func @transform_1(%arg0: i32) -> (i32, i32) {
    %c0_i32 = arith.constant 0 : i32
    %c0_i32_0 = arith.constant 0 : i32
    %c0_i32_1 = arith.constant 0 : i32
    return %c0_i32, %c0_i32_0 : i32, i32
  }
  func.func @transform_2(%arg0: i32) -> (i32, i32) {
    %c0_i32 = arith.constant 0 : i32
    %c0_i32_0 = arith.constant 0 : i32
    %c0_i32_1 = arith.constant 0 : i32
    return %c0_i32, %c0_i32_0 : i32, i32
  }
  func.func @transform_3(%arg0: i32) -> (i32, i32) {
    %c0_i32 = arith.constant 0 : i32
    %c0_i32_0 = arith.constant 0 : i32
    %c0_i32_1 = arith.constant 0 : i32
    return %c0_i32, %c0_i32_0 : i32, i32
  }
  func.func @transform_4(%arg0: i32) -> (i32, i32) {
    %c0_i32 = arith.constant 0 : i32
    %c0_i32_0 = arith.constant 0 : i32
    %c0_i32_1 = arith.constant 0 : i32
    return %c0_i32, %c0_i32_0 : i32, i32
  }
  func.func @transform_5(%arg0: i32) -> (i32, i32) {
    %c0_i32 = arith.constant 0 : i32
    %c0_i32_0 = arith.constant 0 : i32
    %c0_i32_1 = arith.constant 0 : i32
    return %c0_i32, %c0_i32_0 : i32, i32
  }
  func.func @transform_6(%arg0: i32) -> (i32, i32) {
    %c0_i32 = arith.constant 0 : i32
    %c0_i32_0 = arith.constant 0 : i32
    %c0_i32_1 = arith.constant 0 : i32
    return %c0_i32, %c0_i32_0 : i32, i32
  }
  func.func @transform_7(%arg0: i32) -> (i32, i32) {
    %c0_i32 = arith.constant 0 : i32
    %c0_i32_0 = arith.constant 0 : i32
    %c0_i32_1 = arith.constant 0 : i32
    return %c0_i32, %c0_i32_0 : i32, i32
  }
  func.func @transform_8(%arg0: i32) -> (i32, i32) {
    %c0_i32 = arith.constant 0 : i32
    %c0_i32_0 = arith.constant 0 : i32
    %c0_i32_1 = arith.constant 0 : i32
    return %c0_i32, %c0_i32_0 : i32, i32
  }
  func.func @transform_9(%arg0: i32) -> (i32, i32) {
    %c0_i32 = arith.constant 0 : i32
    %c0_i32_0 = arith.constant 0 : i32
    %c0_i32_1 = arith.constant 0 : i32
    return %c0_i32, %c0_i32_0 : i32, i32
  }
  func.func @transform_10(%arg0: i32) -> (i32, i32) {
    %c0_i32 = arith.constant 0 : i32
    %c0_i32_0 = arith.constant 0 : i32
    %c0_i32_1 = arith.constant 0 : i32
    return %c0_i32, %c0_i32_0 : i32, i32
  }
  func.func @transform_11(%arg0: i32) -> (i32, i32) {
    %c0_i32 = arith.constant 0 : i32
    %c0_i32_0 = arith.constant 0 : i32
    return %arg0, %c0_i32 : i32, i32
  }
}

</mosaic_0001>

<bundles_post_ra>
// kernel: tpu_custom_call.1
= control target key start
LH: loop header
LB: loop body
LE: loop exit
PB: predicated region body
PF: predicated region fallthrough
CT: control target
= control target key end

     0   :  { %s1393_s0 = inlined_call_operand.vmem [shape: f32[2,32,16], index: 0, kind: input, shape index: {}]   ;;  %s1394_s1 = inlined_call_operand.vmem [shape: f32[1,32], index: 1, kind: input, shape index: {}]   ;;  %s1395_s2 = inlined_call_operand.vmem [shape: f32[16,32], index: 2, kind: input, shape index: {}]   ;;  %s1396_s3 = inlined_call_operand.vmem [shape: bf16[32,32], index: 3, kind: input, shape index: {}]   ;;  %s1397_s4 = inlined_call_operand.vmem [shape: f32[1,32], index: 4, kind: input, shape index: {}]   ;;  %s1398_s5 = inlined_call_operand.vmem [shape: bf16[32,64], index: 5, kind: input, shape index: {}]   ;;  %s1399_s6 = inlined_call_operand.vmem [shape: f32[1,64], index: 6, kind: input, shape index: {}]   ;;  %s1400_s7 = inlined_call_operand.vmem [shape: bf16[32,16], index: 7, kind: input, shape index: {}]   ;;  %s1401_s8 = inlined_call_operand.vmem [shape: f32[1,16], index: 8, kind: input, shape index: {}]   ;;  %s1402_s9 = inlined_call_operand.vmem [shape: f32[32,4], index: 9, kind: input, shape index: {}]   ;;  %s1403_s10 = inlined_call_operand.vmem [shape: f32[4,32], index: 10, kind: input, shape index: {}]   ;;  %s1404_s11 = inlined_call_operand.hbm [shape: f32[2,16], index: 11, kind: output, shape index: {}]  }
   0x1   :  { %v983_v0 = vld [vmem:[%s1393_s0 + $0x20] sm:$0xff]  ;;  %v984_v2 = vld [vmem:[%s1393_s0 + $0x28] sm:$0xff]  ;;  %v985_v4 = vld [vmem:[%s1393_s0 + $0x30] sm:$0xff] }
   0x2   :  { %v42_v1 = vld [vmem:[%s1393_s0] sm:$0xff]  ;;  %101 = vxpose.xlu1.b32.start [1/4] (short) (narrow) %v983_v0, 16  ;;  %v43_v3 = vld [vmem:[%s1393_s0 + $0x8] sm:$0xff]  ;;  %v44_v5 = vld [vmem:[%s1393_s0 + $0x10] sm:$0xff] }
   0x3   :  { %46 = vxpose.xlu0.b32.start [1/4] (short) (narrow) %v42_v1, 16 }
   0x6   :  { %102 = vxpose.xlu1.b32.cont [2/4] (short) (narrow) %v984_v2, 16 }
   0x7   :  { %47 = vxpose.xlu0.b32.cont [2/4] (short) (narrow) %v43_v3, 16 }
   0x8   :  { %16 = vsyncpa [#allocation5], 0  ;;  %v986_v6 = vld [vmem:[%s1393_s0 + $0x38] sm:$0xff]  ;;  %v1122_v8 = vld [vmem:[%s1396_s3 + $0x8] sm:$0xff]   ;;  %v1162_v10 = vmov 0.0   ;;  %vm1163_vm0 = vmmov 0   ;;  %v432_v59 = vlaneseq }
   0x9   :  { %v45_v7 = vld [vmem:[%s1393_s0 + $0x18] sm:$0xff]  ;;  %v1257_v9 = vld [vmem:[%s1398_s5 + $0x8] sm:$0xff]   ;;  %1047 = vmatprep.subr.bf16.mxu0 %v1162_v10  ;;  %1055 = vmatprep.subr.bf16.mxu1 %v1162_v10  ;;  %v1124_v11 = vld [vmem:[%s1396_s3] sm:$0xff]   ;;  %vm80_vm1 = vcmask 261120   ;;  %vm94_vm2 = vcmask 253952   ;;  %vm644_vm3 = vcmask 1043456  }
   0xa   :  { %103 = vxpose.xlu1.b32.cont [3/4] (short) (narrow) %v985_v4, 16  ;;  %1048 = vmatpush3.bf16.msra.mxu0 %v1122_v8  ;;  %v1125_v12 = vld [vmem:[%s1398_s5] sm:$0xff]   ;;  %v41_v18 = vld [vmem:[%s1395_s2 + $0x8] sm:$0xff]  ;;  %v352_v53 = vld [vmem:[%s1402_s9 + $0x18] sm:$0xff]  ;;  %v1164_v57 = vmov 1966171168  }
   0xb   :  { %48 = vxpose.xlu0.b32.cont [3/4] (short) (narrow) %v44_v5, 16  ;;  %1056 = vmatpush3.bf16.msra.mxu1 %v1257_v9  ;;  %v40_v13 = vld [vmem:[%s1395_s2] sm:$0xff]  ;;  %v351_v54 = vld [vmem:[%s1402_s9 + $0x10] sm:$0xff]  ;;  %v350_v55 = vld [vmem:[%s1402_s9 + $0x8] sm:$0xff]  ;;  %v430_v58 = vunpack.c.l.s4 %v1164_v57  ;;  %v433_v61 = vshrl.u32 %v432_v59, 7  ;;  %vm562_vm4 = vcmask 31744  }
   0xc   :  { %1049 = vmatprep.subr.bf16.mxu0 %v1162_v10  ;;  %1057 = vmatprep.subr.bf16.mxu1 %v1162_v10  ;;  %v987_v43 = vld [vmem:[%s1394_s1] ss:$0 sm:$0xff]  ;;  %vm590_vm5 = vcmask 1041409   ;;  %s1166_s19 = smov [#allocation4]   ;;  %vm967_vm6 = vcmask 123904  }
   0xd   :  { %1051 = vmatprep.mubr.msk.bf16.mxu0 %vm1163_vm0, %v1162_v10  ;;  %1059 = vmatprep.mubr.msk.bf16.mxu1 %vm1163_vm0, %v1162_v10  ;;  %v349_v56 = vld [vmem:[%s1402_s9] sm:$0xff]  ;;  %v431_v60 = vunpack.c.0.s8 %v430_v58  ;;  %s975_s20 = sshll.u32 %s1166_s19, 4  ;;  %s976_s20 = int_to_ptr.vmem [resolvable:$true] %s975_s20 }
   0xe   :  { %104 = vxpose.xlu1.b32.end [4/4] (short) (narrow) %v986_v6, 16  ;;  %1050 = vmatpush3.bf16.msra.mxu0 %v1124_v11  ;;  %v988_v62 = vld [vmem:[%s1397_s4] ss:$0 sm:$0xff]  ;;  %s1165_s4 = smov 96   ;;  %s1140_s3 = scalar_lea.vmem %s976_s20, 32 }
   0xf   :  { %49 = vxpose.xlu0.b32.end [4/4] (short) (narrow) %v45_v7, 16  ;;  %1058 = vmatpush3.bf16.msra.mxu1 %v1125_v12  ;;  %v992_v1 = vld [vmem:[%s1399_s6] ss:$0 sm:$0xff]  ;;  %v1323_v3 = vsub.s32 %v431_v60, %v433_v61  ;;  %p1141_p0 = scmp.ne.s32.totalorder %s976_s20, %s1140_s3  ;;  %p1145_p1 = scmp.lt.s32.totalorder %s976_s20, %s976_s20 }
  0x10   :  { %1063 = vmatprep.subr.bf16.mxu0 %v1257_v9  ;;  %1071 = vmatprep.subr.mxu1 %v1162_v10  ;;  %p1146_p2 = scmp.lt.s32.totalorder %s1140_s3, %s1140_s3 }
  0x12   :  { %p1147_p3 = por %p1146_p2, %p1145_p1 }
  0x14   :  { %p1148_p4 = pnand %p1147_p3, %p1141_p0 }
  0x7e   :  { %v117_v14 = vpop.trf.xlu1 }
  0x7f   :  { %v62_v15 = vpop.trf.xlu0  ;;  %v133_v16 = vadd.f32 %v117_v14, %v40_v13  ;;  %v137_v19 = vsel %vm80_vm1, %v117_v14, 0.0 }
  0x80   :  { %v78_v17 = vadd.f32 %v62_v15, %v40_v13  ;;  %v83_v20 = vsel %vm80_vm1, %v62_v15, 0.0 }
  0x81   :  { %135 = vst.msk [vmem:[#allocation2 + $0x10] sm:$0xff] %vm80_vm1, %v133_v16 }
  0x82   :  { %81 = vst.msk [vmem:[#allocation2] sm:$0xff] %vm80_vm1, %v78_v17  ;;  %v118_v21 = vpop.trf.xlu1  ;;  %v1328_v17 = vsub.s32 0, %v433_v61 }
  0x83   :  { %v63_v22 = vpop.trf.xlu0  ;;  %v134_v23 = vadd.f32 %v118_v21, %v41_v18  ;;  %v138_v24 = vsel %vm80_vm1, %v118_v21, 0.0 }
  0x84   :  { %v79_v25 = vadd.f32 %v63_v22, %v41_v18  ;;  %v84_v26 = vsel %vm80_vm1, %v63_v22, 0.0  ;;  %v139_v27 = vadd.f32 %v138_v24, %v137_v19 }
  0x85   :  { %v85_v28 = vadd.f32 %v84_v26, %v83_v20  ;;  %136 = vst.msk [vmem:[#allocation2 + $0x18] sm:$0xff] %vm80_vm1, %v134_v23 }
  0x86   :  { %82 = vst.msk [vmem:[#allocation2 + $0x8] sm:$0xff] %vm80_vm1, %v79_v25  ;;  %v140_v29 = vrot.slane %v139_v27, 4 }
  0x87   :  { %v86_v30 = vrot.slane %v85_v28, 4 }
  0x88   :  { %v141_v31 = vadd.f32 %v140_v29, %v139_v27  ;;  %v160_v51 = vld [vmem:[#allocation2 + $0x10] sm:$0xff] }
  0x89   :  { %v87_v32 = vadd.f32 %v86_v30, %v85_v28  ;;  %v158_v48 = vld [vmem:[#allocation2] sm:$0xff] }
  0x8a   :  { %v142_v33 = vrot.slane %v141_v31, 2 }
  0x8b   :  { %v88_v34 = vrot.slane %v87_v32, 2 }
  0x8c   :  { %v143_v35 = vadd.f32 %v142_v33, %v141_v31  ;;  %v161_v50 = vld [vmem:[#allocation2 + $0x18] sm:$0xff]  ;;  %v1344_v33 = vld [vmem:[%s1403_s10] sm:$0xf] }
  0x8d   :  { %v89_v36 = vadd.f32 %v88_v34, %v87_v32  ;;  %v159_v46 = vld [vmem:[#allocation2 + $0x8] sm:$0xff]  ;;  %v163_v52 = vpack.c.bf16 %v161_v50, %v160_v51 }
  0x8e   :  { %v144_v37 = vrot.slane %v143_v35, 1  ;;  %v162_v49 = vpack.c.bf16 %v159_v46, %v158_v48 }
  0x8f   :  { %v90_v38 = vrot.slane %v89_v36, 1 }
  0x90   :  { %v145_v39 = vadd.f32 %v144_v37, %v143_v35 }
  0x91   :  { %v91_v40 = vadd.f32 %v90_v38, %v89_v36 }
  0x92   :  { %v146_v41 = vmul.f32 0.0625, %v145_v39 }
  0x93   :  { %v93_v42 = vmul.f32 0.0625, %v91_v40 }
  0x94   :  { %147 = vst.msk [vmem:[#allocation3 + $0x1] sm:$0x1] %vm94_vm2, %v146_v41 }
  0x95   :  { %95 = vst.msk [vmem:[#allocation3] sm:$0x1] %vm94_vm2, %v93_v42 }
  0x9c   :  { %v148_v44 = vld [vmem:[#allocation3] sm:$0x3] }
  0x9d   :  { %v156_v45 = vadd.f32 %v987_v43, %v148_v44 }
  0x9f   :  { %v157_v47 = vpack.c.bf16 %v156_v45, %v156_v45 }
  0xa1   :  { %1052 = vmatmul.mubr.msk.bf16.vlgmr.msra.gmra.mxu0 %vm80_vm1, %v157_v47  ;;  %1060 = vmatmul.mubr.msk.bf16.vlgmr.msra.gmra.mxu1 %vm80_vm1, %v157_v47 }
  0xa2   :  { %1064 = vmatpush3.bf16.msra.mxu0 %v1257_v9  ;;  %1067 = vmatprep.mubr.msk.bf16.mxu0 %vm80_vm1, %v162_v49 }
  0xa3   :  { %1065 = vmatprep.subr.bf16.mxu0 %v1125_v12  ;;  %1079 = vmatprep.mubr.msk.f32.mxu1 %vm1163_vm0, %v1162_v10 }
  0xa4   :  { %1072 = vmatpush3.msra.mxu1 %v352_v53 }
  0xa5   :  { %1073 = vmatprep.subr.mxu1 %v1162_v10 }
  0xa6   :  { %1066 = vmatpush3.bf16.msra.mxu0 %v1125_v12  ;;  %1074 = vmatpush3.msra.mxu1 %v351_v54 }
  0xa7   :  { %1082 = vmatprep.subr.mxu0 %v352_v53  ;;  %1075 = vmatprep.subr.mxu1 %v1162_v10 }
  0xa8   :  { %1076 = vmatpush3.msra.mxu1 %v350_v55 }
  0xa9   :  { %1068 = vmatmul.mubr.msk.bf16.vlgmr.msra.gmra.mxu0 %vm80_vm1, %v163_v52  ;;  %1077 = vmatprep.subr.mxu1 %v1162_v10 }
  0xaa   :  { %1083 = vmatpush3.msra.mxu0 %v352_v53  ;;  %1078 = vmatpush3.msra.mxu1 %v349_v56 }
  0xab   :  { %1084 = vmatprep.subr.mxu0 %v351_v54  ;;  %1096 = vmatprep.subr.mxu1 %v1162_v10 }
  0xac   :  { %1085 = vmatpush3.msra.mxu0 %v351_v54 }
  0xad   :  { %1086 = vmatprep.subr.mxu0 %v350_v55 }
  0xae   :  { %1087 = vmatpush3.msra.mxu0 %v350_v55 }
  0xaf   :  { %1088 = vmatprep.subr.mxu0 %v349_v56 }
  0xb0   :  { %1089 = vmatpush3.msra.mxu0 %v349_v56 }
  0xb1   :  { %1109 = vmatprep.subr.bf16.mxu0 %v1162_v10 }
 0x161   :  { %v224_v63 = vpop.f32.mrf.mxu0  ;;  %v288_v0 = vpop.f32.mrf.mxu1 }
 0x162   :  { %v225_v2 = vadd.f32 %v988_v62, %v224_v63  ;;  %v289_v7 = vadd.f32 %v992_v1, %v288_v0 }
 0x163   :  { %v1053_v4 = vpop.f32.mrf.mxu0  ;;  %v1061_v5 = vpop.f32.mrf.mxu1 }
 0x164   :  { %v230_v6 = vmul.f32 0.35355338, %v225_v2 }
 0x165   :  { %v227_v8 = vpop.f32.mrf.mxu0  ;;  %v291_v9 = vpop.f32.mrf.mxu1 }
 0x166   :  { %v435_v11 = vrot.slane %v230_v6, %v1323_v3  ;;  %v354_v12 = vmul.f32 %v289_v7, %v230_v6 }
 0x167   :  { %v1054_v13 = vpop.f32.mrf.mxu0  ;;  %v1062_v14 = vpop.f32.mrf.mxu1 }
 0x168   :  { %v436_v15 = vcombine.high %v435_v11, %v435_v11  ;;  %v443_v16 = vrot.slane %v435_v11, %v1323_v3  ;;  %1080 = vmatmul.mubr.msk.f32.vlgmr.msra.gmra.mxu1 %vm80_vm1, %v354_v12 }
 0x169   :  { %v1069_v18 = vpop.f32.mrf.mxu0  ;;  %1098 = vmatprep.mubr.msk.f32.mxu1 %vm1163_vm0, %v1162_v10  ;;  %1097 = vmatpush3.msk.msra.mxu1 %vm644_vm3, %v1344_v33 }
 0x16a   :  { %v343_v19 = vadd.f32 %v1069_v18, %v992_v1  ;;  %v450_v20 = vrot.slane %v436_v15, %v1323_v3  ;;  %v454_v23 = vrot.slane %v443_v16, %v1328_v17  ;;  %1101 = vmatprep.subr.msk.mxu1 %vm644_vm3, %v1344_v33 }
 0x16b   :  { %v334_v21 = vpop.f32.mrf.mxu0 }
 0x16c   :  { %v335_v22 = vadd.f32 %v992_v1, %v334_v21  ;;  %865 = vrot.lane.b32.xlu1 %v343_v19, %s1165_s4  ;;  %v458_v26 = vrot.slane %v450_v20, %v1328_v17 }
 0x16d   :  { %v1070_v24 = vpop.f32.mrf.mxu0 }
 0x16e   :  { %v461_v25 = vmul.f32 %v454_v23, %v335_v22  ;;  %861 = vrot.lane.b32.xlu0 %v335_v22, %s1165_s4  ;;  %v346_v29 = vadd.f32 %v1070_v24, %v992_v1  ;;  %v463_v31 = vmul.f32 %v458_v26, %v343_v19 }
 0x16f   :  { %v337_v27 = vpop.f32.mrf.mxu0 }
 0x170   :  { %v338_v28 = vadd.f32 %v992_v1, %v337_v27  ;;  %1090 = vmatprep.mubr.msk.f32.mxu0 %vm80_vm1, %v461_v25  ;;  %v464_v32 = vmul.f32 %v458_v26, %v346_v29 }
 0x172   :  { %v462_v30 = vmul.f32 %v454_v23, %v338_v28  ;;  %863 = vrot.lane.b32.xlu1 %v338_v28, %s1165_s4 }
 0x174   :  { %1091 = vmatmul.mubr.msk.f32.vlgmr.msra.gmra.mxu0 %vm80_vm1, %v462_v30 }
 0x175   :  { %1093 = vmatprep.mubr.msk.f32.mxu0 %vm80_vm1, %v463_v31 }
 0x176   :  { %867 = vrot.lane.b32.xlu1 %v346_v29, %s1165_s4 }
 0x178   :  { %1094 = vmatmul.mubr.msk.f32.gmra.mxu0 %vm80_vm1, %v464_v32 }
 0x179   :  { %1113 = vmatprep.mubr.msk.bf16.mxu0 %vm1163_vm0, %v1162_v10 }
 0x17a   :  { %853 = vrot.lane.b32.xlu1 %v289_v7, %s1165_s4 }
 0x228   :  { %v424_v34 = vpop.f32.mrf.mxu1 }
 0x229   :  { %v582_v58 = vrot.slane %v424_v34, 1 }
 0x22a   :  { %v1081_v35 = vpop.f32.mrf.mxu1 }
 0x234   :  { %v1092_v36 = vpop.f32.mrf.mxu0 }
 0x235   :  { %v564_v38 = vsel %vm562_vm4, %v1092_v36, -inf }
 0x236   :  { %v543_v37 = vpop.f32.mrf.mxu0 }
 0x237   :  { %v563_v39 = vsel %vm562_vm4, %v543_v37, -inf }
 0x238   :  { %v565_v40 = vmax.f32 %v563_v39, %v564_v38  ;;  %v1095_v41 = vpop.f32.mrf.mxu0 }
 0x239   :  { %v573_v44 = vsel %vm562_vm4, %v1095_v41, -inf }
 0x23a   :  { %v566_v42 = vrot.slane %v565_v40, 4  ;;  %v553_v43 = vpop.f32.mrf.mxu0 }
 0x23b   :  { %v572_v45 = vsel %vm562_vm4, %v553_v43, -inf }
 0x23c   :  { %v567_v46 = vmax.f32 %v565_v40, %v566_v42  ;;  %v574_v47 = vmax.f32 %v572_v45, %v573_v44 }
 0x23e   :  { %v568_v48 = vrot.slane %v567_v46, 2  ;;  %v575_v49 = vrot.slane %v574_v47, 4 }
 0x240   :  { %v569_v50 = vmax.f32 %v567_v46, %v568_v48  ;;  %v576_v51 = vmax.f32 %v574_v47, %v575_v49 }
 0x242   :  { %v570_v52 = vrot.slane %v569_v50, 1  ;;  %v577_v53 = vrot.slane %v576_v51, 2 }
 0x244   :  { %v571_v54 = vmax.f32 %v569_v50, %v570_v52  ;;  %v578_v55 = vmax.f32 %v576_v51, %v577_v53  ;;  %v866_v52 = vpop.permute.xlu1 %865 }
 0x246   :  { %v585_v56 = vmax.f32 %v571_v54, %v424_v34  ;;  %v579_v57 = vrot.slane %v578_v55, 1 }
 0x248   :  { %v599_v59 = vrot.slane %v585_v56, %v1328_v17  ;;  %v580_v60 = vmax.f32 %v578_v55, %v579_v57  ;;  %v864_v54 = vpop.permute.xlu1 %863  ;;  %v862_v57 = vpop.permute.xlu0 %861 }
 0x24a   :  { %v604_v61 = vsub.f32 %v543_v37, %v599_v59  ;;  %v605_v62 = vsub.f32 %v1092_v36, %v599_v59  ;;  %v586_v63 = vmax.f32 %v580_v60, %v582_v58 }
 0x24c   :  { %v608_v0 = vmul.f32 1.442695, %v604_v61  ;;  %v610_v1 = vmul.f32 1.442695, %v605_v62  ;;  %v603_v2 = vrot.slane %v586_v63, %v1328_v17  ;;  %v589_v8 = vrot.slane %v586_v63, 7  ;;  %v868_v60 = vpop.permute.xlu1 %867 }
 0x24e   :  { %1128 = vpow2.f32 %v608_v0  ;;  %v606_v4 = vsub.f32 %v553_v43, %v603_v2  ;;  %v607_v5 = vsub.f32 %v1095_v41, %v603_v2  ;;  %v591_v9 = vsel %vm590_vm5, %v589_v8, %v585_v56 }
 0x24f   :  { %1130 = vpow2.f32 %v610_v1  ;;  %v593_v14 = vsub.f32 %v424_v34, %v591_v9 }
 0x250   :  { %v612_v6 = vmul.f32 1.442695, %v606_v4  ;;  %v614_v7 = vmul.f32 1.442695, %v607_v5 }
 0x251   :  { %v594_v20 = vmul.f32 1.442695, %v593_v14 }
 0x252   :  { %1132 = vpow2.f32 %v612_v6 }
 0x253   :  { %1134 = vpow2.f32 %v614_v7 }
 0x254   :  { %1136 = vpow2.f32 %v594_v20 }
 0x25b   :  { %v1129_v11 = vpop.eup %1128 }
 0x25c   :  { %v1131_v12 = vpop.eup %1130  ;;  %v616_v13 = vsel %vm562_vm4, %v1129_v11, 0.0 }
 0x25d   :  { %v617_v15 = vsel %vm562_vm4, %v1131_v12, 0.0 }
 0x25e   :  { %v618_v16 = vadd.f32 %v617_v15, %v616_v13 }
 0x25f   :  { %v1133_v18 = vpop.eup %1132 }
 0x260   :  { %v619_v19 = vrot.slane %v618_v16, 4  ;;  %v625_v21 = vsel %vm562_vm4, %v1133_v18, 0.0  ;;  %v1135_v22 = vpop.eup %1134 }
 0x261   :  { %v626_v24 = vsel %vm562_vm4, %v1135_v22, 0.0  ;;  %v1137_v37 = vpop.eup %1136 }
 0x262   :  { %v620_v23 = vadd.f32 %v619_v19, %v618_v16  ;;  %v627_v25 = vadd.f32 %v626_v24, %v625_v21  ;;  %v854_v19 = vpop.permute.xlu1 %853 }
 0x264   :  { %v621_v26 = vrot.slane %v620_v23, 2  ;;  %v628_v27 = vrot.slane %v627_v25, 4 }
 0x266   :  { %v622_v28 = vadd.f32 %v621_v26, %v620_v23  ;;  %v629_v29 = vadd.f32 %v628_v27, %v627_v25  ;;  %v1010_v26 = vld [vmem:[%s1401_s8] ss:$0 sm:$0xff] }
 0x268   :  { %v630_v30 = vrot.slane %v629_v29, 2  ;;  %v623_v31 = vrot.slane %v622_v28, 1 }
 0x26a   :  { %v631_v32 = vadd.f32 %v630_v30, %v629_v29  ;;  %v624_v35 = vadd.f32 %v623_v31, %v622_v28 }
 0x26c   :  { %v632_v34 = vrot.slane %v631_v32, 1 }
 0x26e   :  { %v633_v36 = vadd.f32 %v632_v34, %v631_v32 }
 0x270   :  { %v636_v38 = vsel %vm590_vm5, %v633_v36, %v624_v35 }
 0x271   :  { %v638_v39 = vadd.f32 %v1137_v37, %v636_v38 }
 0x273   :  { %1138 = vrcp.f32 %v638_v39 }
 0x280   :  { %v1139_v40 = vpop.eup %1138 }
 0x281   :  { %v640_v41 = vmul.f32 %v1139_v40, %v1137_v37  ;;  %v725_v42 = vrot.slane %v1139_v40, %v1323_v3 }
 0x283   :  { %1099 = vmatmul.mubr.msk.f32.vlgmr.msra.gmra.mxu1 %vm562_vm4, %v640_v41  ;;  %v733_v43 = vrot.slane %v725_v42, %v1323_v3  ;;  %v726_v44 = vcombine.high %v725_v42, %v725_v42 }
 0x284   :  { %1102 = vmatpush3.msk.msra.mxu1 %vm644_vm3, %v1344_v33  ;;  %v1126_v33 = vld [vmem:[%s1400_s7 + $0x8] sm:$0xff]  }
 0x285   :  { %v744_v45 = vrot.slane %v733_v43, %v1328_v17  ;;  %v740_v46 = vrot.slane %v726_v44, %v1323_v3  ;;  %1110 = vmatpush3.bf16.msra.mxu0 %v1126_v33  ;;  %v1127_v3 = vld [vmem:[%s1400_s7] sm:$0xff]  }
 0x286   :  { %1111 = vmatprep.subr.bf16.mxu0 %v1162_v10 }
 0x287   :  { %v751_v47 = vmul.f32 %v1129_v11, %v744_v45  ;;  %v752_v48 = vmul.f32 %v1131_v12, %v744_v45  ;;  %v748_v49 = vrot.slane %v740_v46, %v1328_v17 }
 0x289   :  { %1103 = vmatprep.mubr.msk.f32.mxu1 %vm562_vm4, %v751_v47  ;;  %v753_v50 = vmul.f32 %v1133_v18, %v748_v49  ;;  %v754_v51 = vmul.f32 %v1135_v22, %v748_v49  ;;  %1112 = vmatpush3.bf16.msra.mxu0 %v1127_v3 }
 0x28a   :  { %1104 = vmatmul.mubr.msk.f32.vlgmr.msra.gmra.mxu1 %vm562_vm4, %v752_v48 }
 0x28b   :  { %1106 = vmatprep.mubr.msk.f32.mxu1 %vm562_vm4, %v753_v50 }
 0x28e   :  { %1107 = vmatmul.mubr.msk.f32.gmra.mxu1 %vm562_vm4, %v754_v51 }
 0x343   :  { %v714_v17 = vpop.f32.mrf.mxu1 }
 0x344   :  { %v856_v22 = vmul.f32 %v854_v19, %v714_v17 }
 0x345   :  { %v1100_v53 = vpop.f32.mrf.mxu1 }
 0x34a   :  { %v1105_v55 = vpop.f32.mrf.mxu1 }
 0x34b   :  { %v874_v56 = vmul.f32 %v1105_v55, %v864_v54 }
 0x34c   :  { %v833_v58 = vpop.f32.mrf.mxu1 }
 0x34d   :  { %v873_v59 = vmul.f32 %v862_v57, %v833_v58  ;;  %v878_v62 = vsel %vm80_vm1, %v874_v56, 0.0 }
 0x34e   :  { %v1108_v61 = vpop.f32.mrf.mxu1 }
 0x34f   :  { %v877_v10 = vsel %vm80_vm1, %v873_v59, 0.0  ;;  %v876_v63 = vmul.f32 %v1108_v61, %v868_v60 }
 0x350   :  { %v879_v0 = vadd.f32 %v878_v62, %v877_v10  ;;  %v843_v1 = vpop.f32.mrf.mxu1 }
 0x351   :  { %v875_v2 = vmul.f32 %v866_v52, %v843_v1  ;;  %v887_v5 = vsel %vm80_vm1, %v876_v63, 0.0 }
 0x352   :  { %v880_v4 = vrot.slane %v879_v0, 4 }
 0x353   :  { %v886_v6 = vsel %vm80_vm1, %v875_v2, 0.0 }
 0x354   :  { %v881_v7 = vadd.f32 %v880_v4, %v879_v0  ;;  %v888_v8 = vadd.f32 %v887_v5, %v886_v6 }
 0x356   :  { %v882_v9 = vrot.slane %v881_v7, 2  ;;  %v889_v11 = vrot.slane %v888_v8, 4 }
 0x358   :  { %v883_v12 = vadd.f32 %v882_v9, %v881_v7  ;;  %v890_v13 = vadd.f32 %v889_v11, %v888_v8 }
 0x35a   :  { %v891_v14 = vrot.slane %v890_v13, 2  ;;  %v884_v15 = vrot.slane %v883_v12, 1 }
 0x35c   :  { %v892_v16 = vadd.f32 %v891_v14, %v890_v13  ;;  %v885_v20 = vadd.f32 %v884_v15, %v883_v12 }
 0x35e   :  { %v893_v18 = vrot.slane %v892_v16, 1 }
 0x360   :  { %v894_v21 = vadd.f32 %v893_v18, %v892_v16 }
 0x362   :  { %v897_v23 = vsel %vm590_vm5, %v894_v21, %v885_v20 }
 0x363   :  { %v899_v24 = vadd.f32 %v897_v23, %v856_v22 }
 0x365   :  { %v900_v25 = vpack.c.bf16 %v899_v24, %v899_v24 }
 0x367   :  { %1114 = vmatmul.mubr.msk.bf16.vlgmr.msra.gmra.mxu0 %vm80_vm1, %v900_v25 }
 0x427   :  { %v961_v27 = vpop.f32.mrf.mxu0 }
 0x428   :  { %v962_v28 = vadd.f32 %v1010_v26, %v961_v27 }
 0x429   :  { %v1115_v29 = vpop.f32.mrf.mxu0 }
 0x42a   :  { %968 = vst.msk [vmem:[#allocation4] sm:$0x3] %vm967_vm6, %v962_v28 }
 0x42b   :  { %v964_v30 = vpop.f32.mrf.mxu0 }
 0x42c   :  { %1151 = shalt.err (!%p1148_p4)
}
 0x42d   :  { %978 = dma.vmem_to_hbm [thread:$0]  %s976_s20, 32, %s1404_s11, [#allocation5]   ;;  %v1116_v31 = vpop.f32.mrf.mxu0 }
 0x42e   :  { %1160 = dma.done.wait [#allocation5], 32  }
 0x42f   :  { %1161 = vsyncadd [#allocation5], 4294967264 }
 0x430   :  { %982 = vsyncpa [#allocation5], 1 }

</bundles_post_ra>
